<compile_context>
chip_gen: v7x
topology: tpu7x:2x2x1
jax: 0.10.0
libtpu: 0.0.40
codegen_flags: <defaults>
</compile_context>

<pallas_src>
import jax
import jax.numpy as jnp
from jax.experimental import pallas as pl
from jax.experimental.pallas import tpu as pltpu


def value_kernel(x_ref, cw_ref, w1t_ref, b1_ref, w2t_ref, sc_ref, o_ref):
    # x_ref  : (C, S, Bt)  bf16  -- activations, batch on the lane axis
    # cw_ref : (C, 1, 1)   f32   -- conv weight with BN scale folded in
    # w1t_ref: (hsz, S)    bf16  -- first linear, pre-transposed
    # b1_ref : (hsz, 1)    f32
    # w2t_ref: (1, hsz)    f32   -- second linear, pre-transposed
    # sc_ref : (2,)        f32   -- SMEM scalars: [folded conv+BN bias, b2]
    # o_ref  : (1, Bt)     f32   -- lane-dense output
    x = x_ref[...].astype(jnp.float32)

    # 1x1 conv (single output channel) + folded BN affine + ReLU (pure VPU).
    v = jnp.sum(x * cw_ref[...], axis=0) + sc_ref[0]           # (S, Bt)
    v = jnp.maximum(v, 0.0)

    # Linear(outd, hsz) + ReLU on the MXU, lane-dense result.
    h = jnp.dot(w1t_ref[...], v.astype(jnp.bfloat16),
                preferred_element_type=jnp.float32) + b1_ref[...]
    h = jnp.maximum(h, 0.0)                                    # (hsz, Bt)

    # Linear(hsz, 1) + Tanh : (1,hsz)@(hsz,Bt) -> (1,Bt), lane-dense store.
    y = jnp.dot(w2t_ref[...], h, preferred_element_type=jnp.float32) + sc_ref[1]
    o_ref[...] = jnp.tanh(y)


def value_forward(x_nchw, p, eps=1e-5, b_tile_max=1024):
    """Full Value.forward as one pipelined Pallas call. Returns (B, 1) f32."""
    B, C, H, W = x_nchw.shape
    S = H * W
    hsz = p["w1"].shape[1]

    # ---- fold eval-mode BN + conv bias into conv weights (single channel) ----
    bn_scale = (p["bn_gamma"] / jnp.sqrt(p["bn_var"] + eps)).astype(jnp.float32)
    bn_shift = (p["bn_beta"] - p["bn_mean"] * bn_scale).astype(jnp.float32)
    cw = (p["conv_w"].reshape(C) * bn_scale[0]).reshape(C, 1, 1).astype(jnp.float32)
    bias0 = p["conv_b"][0] * bn_scale[0] + bn_shift[0]
    scalars = jnp.stack([bias0, p["b2"][0]]).astype(jnp.float32)      # (2,) -> SMEM

    # ---- lane-dense layout: B on the last axis, padded to the tile size ----
    lane = 128
    b_tile = min(pl.cdiv(B, lane) * lane, b_tile_max)
    b_pad = pl.cdiv(B, b_tile) * b_tile
    x = x_nchw.reshape(B, C, S).transpose(1, 2, 0)                    # (C, S, B)
    x = jnp.pad(x, ((0, 0), (0, 0), (0, b_pad - B))).astype(jnp.bfloat16)

    w1t = p["w1"].T.astype(jnp.bfloat16)                              # (hsz, S)
    b1 = p["b1"].reshape(hsz, 1).astype(jnp.float32)                  # (hsz, 1)
    w2t = p["w2"].T.astype(jnp.float32)                               # (1, hsz)

    grid = (b_pad // b_tile,)
    out = pl.pallas_call(
        value_kernel,
        out_shape=jax.ShapeDtypeStruct((1, b_pad), jnp.float32),
        grid_spec=pltpu.PrefetchScalarGridSpec(
            num_scalar_prefetch=0,
            grid=grid,
            in_specs=[
                pl.BlockSpec((C, S, b_tile), lambda i: (0, 0, i)),     # streamed
                pl.BlockSpec((C, 1, 1), lambda i: (0, 0, 0)),          # resident
                pl.BlockSpec((hsz, S), lambda i: (0, 0)),              # resident
                pl.BlockSpec((hsz, 1), lambda i: (0, 0)),              # resident
                pl.BlockSpec((1, hsz), lambda i: (0, 0)),              # resident
                pl.BlockSpec(memory_space=pltpu.MemorySpace.SMEM),     # scalars
            ],
            out_specs=pl.BlockSpec((1, b_tile), lambda i: (0, i)),
        ),
        compiler_params=pltpu.CompilerParams(
            dimension_semantics=("parallel",)),
    )(x, cw, w1t, b1, w2t, scalars)

    return out[:, :B].T                                               # (B, 1)


def reference_forward(x_nchw, p, eps=1e-5):
    """Pure-JAX f32 reference mirroring the PyTorch forward (eval-mode BN)."""
    B, C, H, W = x_nchw.shape
    conv = jnp.einsum("bchw,oc->bohw", x_nchw, p["conv_w"]) \
        + p["conv_b"][None, :, None, None]
    scale = p["bn_gamma"] / jnp.sqrt(p["bn_var"] + eps)
    bn = (conv - p["bn_mean"][None, :, None, None]) * scale[None, :, None, None] \
        + p["bn_beta"][None, :, None, None]
    r = jnp.maximum(bn, 0.0)
    v = r.reshape(B, -1)
    h = jnp.maximum(v @ p["w1"] + p["b1"], 0.0)
    return jnp.tanh(h @ p["w2"] + p["b2"])


if __name__ == "__main__":
    # Small shapes consistent with the module:
    #   ind = 4 channels, kernels = 1, H = W = 4  =>  outd = 16, hsz = 32
    B, C, H, W = 2, 4, 4, 4
    outd = H * W
    hsz = 32

    key = jax.random.PRNGKey(0)
    k = jax.random.split(key, 8)

    x = jax.random.normal(k[0], (B, C, H, W), jnp.float32)

    # Deterministic parameter init; linear weights mimic _reset_parameters
    # (uniform(-0.1, 0.1)).  Conv weight/bias also uniform for determinism.
    params = {
        "conv_w": jax.random.uniform(k[1], (1, C), jnp.float32, -0.1, 0.1),
        "conv_b": jax.random.uniform(k[2], (1,), jnp.float32, -0.1, 0.1),
        "bn_gamma": jnp.ones((1,), jnp.float32),
        "bn_beta": jnp.zeros((1,), jnp.float32),
        "bn_mean": jnp.zeros((1,), jnp.float32),
        "bn_var": jnp.ones((1,), jnp.float32),
        "w1": jax.random.uniform(k[3], (outd, hsz), jnp.float32, -0.1, 0.1),
        "b1": jax.random.uniform(k[4], (hsz,), jnp.float32, -0.1, 0.1),
        "w2": jax.random.uniform(k[5], (hsz, 1), jnp.float32, -0.1, 0.1),
        "b2": jax.random.uniform(k[6], (1,), jnp.float32, -0.1, 0.1),
    }

    out = value_forward(x, params)
    jax.block_until_ready(out)

    ref = reference_forward(x, params)
    assert out.shape == (B, 1), out.shape
    # bf16 activations/weights on the matmul path -> compare loosely vs f32 ref.
    assert jnp.allclose(out, ref, atol=2e-2, rtol=2e-2), (out, ref)

    print("KERNEL_OK")
</pallas_src>

<mosaic_0001>
module attributes {stable_mosaic.version = 11 : i64} {
  func.func @value_kernel(%arg0: i32, %arg1: memref<4x16x128xbf16, #tpu.memory_space<vmem>>, %arg2: memref<4x1x1xf32, #tpu.memory_space<vmem>>, %arg3: memref<32x16xbf16, #tpu.memory_space<vmem>>, %arg4: memref<32x1xf32, #tpu.memory_space<vmem>>, %arg5: memref<1x32xf32, #tpu.memory_space<vmem>>, %arg6: memref<2xf32, #tpu.memory_space<smem>>, %arg7: memref<1x128xf32, #tpu.memory_space<vmem>>) attributes {dimension_semantics = [#tpu.dimension_semantics<parallel>], iteration_bounds = array<i64: 1>, scalar_prefetch = 0 : i64, scratch_operands = 0 : i64, tpu.core_type = #tpu.core_type<tc>, window_params = [{transform_indices = @transform_0, window_bounds = array<i64: 4, 16, 128>}, {pipeline_mode = #tpu.pipeline_mode<synchronous>, transform_indices = @transform_1, window_bounds = array<i64: 4, 1, 1>}, {pipeline_mode = #tpu.pipeline_mode<synchronous>, transform_indices = @transform_2, window_bounds = array<i64: 32, 16>}, {pipeline_mode = #tpu.pipeline_mode<synchronous>, transform_indices = @transform_3, window_bounds = array<i64: 32, 1>}, {pipeline_mode = #tpu.pipeline_mode<synchronous>, transform_indices = @transform_4, window_bounds = array<i64: 1, 32>}, {transform_indices = @transform_5, window_bounds = array<i64: 2>}, {transform_indices = @transform_6, window_bounds = array<i64: 1, 128>}]} {
    %c0 = arith.constant 0 : index
    %c0_0 = arith.constant 0 : index
    %c0_1 = arith.constant 0 : index
    %0 = vector.load %arg1[%c0, %c0_0, %c0_1] : memref<4x16x128xbf16, #tpu.memory_space<vmem>>, vector<4x16x128xbf16>
    %1 = arith.extf %0 : vector<4x16x128xbf16> to vector<4x16x128xf32>
    %c0_2 = arith.constant 0 : index
    %c0_3 = arith.constant 0 : index
    %c0_4 = arith.constant 0 : index
    %2 = vector.load %arg2[%c0_2, %c0_3, %c0_4] : memref<4x1x1xf32, #tpu.memory_space<vmem>>, vector<4x1x1xf32>
    %3 = vector.broadcast %2 : vector<4x1x1xf32> to vector<4x16x128xf32>
    %4 = arith.mulf %1, %3 : vector<4x16x128xf32>
    %cst = arith.constant dense<0.000000e+00> : vector<16x128xf32>
    %5 = vector.multi_reduction <add>, %4, %cst [0] : vector<4x16x128xf32> to vector<16x128xf32>
    %c0_5 = arith.constant 0 : index
    %6 = memref.load %arg6[%c0_5] : memref<2xf32, #tpu.memory_space<smem>>
    %7 = vector.broadcast %6 : f32 to vector<16x128xf32>
    %8 = arith.addf %5, %7 : vector<16x128xf32>
    %cst_6 = arith.constant 0.000000e+00 : f32
    %9 = vector.broadcast %cst_6 : f32 to vector<16x128xf32>
    %10 = arith.maximumf %8, %9 : vector<16x128xf32>
    %c0_7 = arith.constant 0 : index
    %c0_8 = arith.constant 0 : index
    %11 = vector.load %arg3[%c0_7, %c0_8] : memref<32x16xbf16, #tpu.memory_space<vmem>>, vector<32x16xbf16>
    %12 = arith.truncf %10 : vector<16x128xf32> to vector<16x128xbf16>
    %cst_9 = arith.constant dense<0.000000e+00> : vector<32x128xf32>
    %13 = tpu.matmul %11, %12, %cst_9 {dimension_numbers = #tpu.dot_dimension_numbers<[1], [0], [0], [1], [0, 0, 1, 1], [], []>} : vector<32x16xbf16>, vector<16x128xbf16>, vector<32x128xf32> -> vector<32x128xf32>
    %c0_10 = arith.constant 0 : index
    %c0_11 = arith.constant 0 : index
    %14 = vector.load %arg4[%c0_10, %c0_11] : memref<32x1xf32, #tpu.memory_space<vmem>>, vector<32x1xf32>
    %15 = vector.broadcast %14 : vector<32x1xf32> to vector<32x128xf32>
    %16 = arith.addf %13, %15 : vector<32x128xf32>
    %cst_12 = arith.constant 0.000000e+00 : f32
    %17 = vector.broadcast %cst_12 : f32 to vector<32x128xf32>
    %18 = arith.maximumf %16, %17 : vector<32x128xf32>
    %c0_13 = arith.constant 0 : index
    %c0_14 = arith.constant 0 : index
    %19 = vector.load %arg5[%c0_13, %c0_14] : memref<1x32xf32, #tpu.memory_space<vmem>>, vector<1x32xf32>
    %cst_15 = arith.constant dense<0.000000e+00> : vector<1x128xf32>
    %20 = tpu.matmul %19, %18, %cst_15 {dimension_numbers = #tpu.dot_dimension_numbers<[1], [0], [0], [1], [0, 0, 1, 1], [], []>} : vector<1x32xf32>, vector<32x128xf32>, vector<1x128xf32> -> vector<1x128xf32>
    %c1 = arith.constant 1 : index
    %21 = memref.load %arg6[%c1] : memref<2xf32, #tpu.memory_space<smem>>
    %22 = vector.broadcast %21 : f32 to vector<1x128xf32>
    %23 = arith.addf %20, %22 : vector<1x128xf32>
    %24 = math.tanh %23 : vector<1x128xf32>
    %c0_16 = arith.constant 0 : index
    %c0_17 = arith.constant 0 : index
    %25 = vector.load %arg7[%c0_16, %c0_17] : memref<1x128xf32, #tpu.memory_space<vmem>>, vector<1x128xf32>
    tpu.vector_store %arg7[%c0_16, %c0_17], %24 {strides = array<i32>} : memref<1x128xf32, #tpu.memory_space<vmem>>, vector<1x128xf32>,
    return
  }
  func.func @transform_0(%arg0: i32) -> (i32, i32, i32) {
    %c0_i32 = arith.constant 0 : i32
    %c0_i32_0 = arith.constant 0 : i32
    %c0_i32_1 = arith.constant 0 : i32
    return %c0_i32, %c0_i32_0, %arg0 : i32, i32, i32
  }
  func.func @transform_1(%arg0: i32) -> (i32, i32, i32) {
    %c0_i32 = arith.constant 0 : i32
    %c0_i32_0 = arith.constant 0 : i32
    %c0_i32_1 = arith.constant 0 : i32
    %c0_i32_2 = arith.constant 0 : i32
    return %c0_i32, %c0_i32_0, %c0_i32_1 : i32, i32, i32
  }
  func.func @transform_2(%arg0: i32) -> (i32, i32) {
    %c0_i32 = arith.constant 0 : i32
    %c0_i32_0 = arith.constant 0 : i32
    %c0_i32_1 = arith.constant 0 : i32
    return %c0_i32, %c0_i32_0 : i32, i32
  }
  func.func @transform_3(%arg0: i32) -> (i32, i32) {
    %c0_i32 = arith.constant 0 : i32
    %c0_i32_0 = arith.constant 0 : i32
    %c0_i32_1 = arith.constant 0 : i32
    return %c0_i32, %c0_i32_0 : i32, i32
  }
  func.func @transform_4(%arg0: i32) -> (i32, i32) {
    %c0_i32 = arith.constant 0 : i32
    %c0_i32_0 = arith.constant 0 : i32
    %c0_i32_1 = arith.constant 0 : i32
    return %c0_i32, %c0_i32_0 : i32, i32
  }
  func.func @transform_5(%arg0: i32) -> i32 {
    %c0_i32 = arith.constant 0 : i32
    %c0_i32_0 = arith.constant 0 : i32
    return %c0_i32 : i32
  }
  func.func @transform_6(%arg0: i32) -> (i32, i32) {
    %c0_i32 = arith.constant 0 : i32
    %c0_i32_0 = arith.constant 0 : i32
    return %c0_i32, %arg0 : i32, i32
  }
}

</mosaic_0001>

<bundles_post_ra>
// kernel: tpu_custom_call.1
= control target key start
LH: loop header
LB: loop body
LE: loop exit
PB: predicated region body
PF: predicated region fallthrough
CT: control target
= control target key end

     0   :  { %11 = vsyncpa [#allocation4], 0  ;;  %s520_s0 = inlined_call_operand.vmem [shape: bf16[4,16,128], index: 0, kind: input, shape index: {}]   ;;  %s521_s1 = inlined_call_operand.vmem [shape: f32[4,1,1], index: 1, kind: input, shape index: {}]   ;;  %s522_s2 = inlined_call_operand.vmem [shape: bf16[32,16], index: 2, kind: input, shape index: {}]   ;;  %s523_s3 = inlined_call_operand.vmem [shape: f32[32,1], index: 3, kind: input, shape index: {}]   ;;  %s524_s4 = inlined_call_operand.vmem [shape: f32[1,32], index: 4, kind: input, shape index: {}]   ;;  %s525_s5 = inlined_call_operand.vmem [shape: f32[2], index: 5, kind: input, shape index: {}]   ;;  %s526_s6 = inlined_call_operand.hbm [shape: f32[1,128], index: 6, kind: output, shape index: {}]  }
   0x1   :  { %12 = vsyncpa [#allocation3], 0  ;;  %s29_s23 = sshll.u32 %s525_s5, 4  ;;  %s30_s23 = int_to_ptr.vmem [resolvable:$true] %s29_s23 }
   0x2   :  { %s379_s24 = scalar_lea.vmem %s30_s23, 16  ;;  %p384_p1 = scmp.lt.s32.totalorder %s30_s23, %s30_s23 }
   0x3   :  { %p380_p0 = scmp.ne.s32.totalorder %s30_s23, %s379_s24  ;;  %p385_p2 = scmp.lt.s32.totalorder %s379_s24, %s379_s24 }
   0x5   :  { %p386_p3 = por %p385_p2, %p384_p1 }
   0x7   :  { %p387_p4 = pnand %p386_p3, %p380_p0 }
   0x9   :  { %390 = shalt.err (!%p387_p4)
}
   0xa   :  { %s417_s25 = smov [#allocation2]  }
   0xb   :  { %32 = dma.vmem_to_smem %s30_s23, 16, %s417_s25, [#allocation4]  }
   0xc   :  { %413 = dma.done.wait [#allocation4], 16  }
   0xd   :  { %414 = vsyncadd [#allocation4], 4294967280 }
   0xe   :  { %36 = sfence }
   0xf   :  { %v309_v0 = vld [vmem:[%s521_s1 + $0x2] ss:$0 sm:$0xff]  ;;  %v307_v1 = vld [vmem:[%s521_s1] ss:$0 sm:$0xff]  ;;  %v418_v2 = vmov 0   ;;  %v120_v5 = vld [vmem:[%s523_s3 + $0x8] sm:$0xff] }
  0x10   :  { %374 = vset.pattern.permute.xlu1 %v418_v2  ;;  %373 = vset.pattern.permute.xlu0 %v418_v2  ;;  %v310_v3 = vld [vmem:[%s521_s1 + $0x3] ss:$0 sm:$0xff]  ;;  %v308_v4 = vld [vmem:[%s521_s1 + $0x1] ss:$0 sm:$0xff]  ;;  %v122_v7 = vld [vmem:[%s523_s3 + $0x18] sm:$0xff]  ;;  %vm153_vm0 = vcmask 130048  }
  0x11   :  { %87 = vperm.xlu1 %374, %v309_v0   ;;  %79 = vperm.xlu0 %373, %v307_v1   ;;  %v119_v6 = vld [vmem:[%s523_s3] sm:$0xff]  ;;  %v121_v8 = vld [vmem:[%s523_s3 + $0x10] sm:$0xff]  ;;  %v333_v11 = vld [vmem:[%s520_s0 + $0x8] sm:$0xff]   ;;  %s108_s25 = sld [smem:[#allocation2]]  ;;  %v419_v47 = vmov 0.0|0.0   ;;  %vm420_vm1 = vmmov 0  }
  0x12   :  { %v375_v9 = vld [vmem:[%s522_s2] sm:$0xff]   ;;  %v334_v13 = vld [vmem:[%s520_s0 + $0x10] sm:$0xff]   ;;  %v335_v17 = vld [vmem:[%s520_s0 + $0x18] sm:$0xff]   ;;  %v323_v18 = vunpack.c.l.bf16 %v333_v11  ;;  %v324_v19 = vunpack.c.h.bf16 %v333_v11  ;;  %361 = vmatprep.subr.bf16.mxu1 %v419_v47  ;;  %v421_v48 = vmov 0.0   ;;  %vm216_vm2 = vcmask 261120   ;;  %s315_s28 = sld [smem:[#allocation2 + $0x1]] }
  0x13   :  { %346 = vmatprep.mubr.msk.bf16.mxu0 %vm153_vm0, %v375_v9  ;;  %v318_v10 = vld [vmem:[%s520_s0] sm:$0xff]   ;;  %v327_v20 = vunpack.c.l.bf16 %v334_v13  ;;  %v328_v21 = vunpack.c.h.bf16 %v334_v13  ;;  %v331_v22 = vunpack.c.l.bf16 %v335_v17  ;;  %v332_v23 = vunpack.c.h.bf16 %v335_v17  ;;  %v376_v46 = vld [vmem:[%s522_s2 + $0x8] sm:$0xff]   ;;  %358 = vmatprep.mubr.msk.f32.mxu1 %vm420_vm1, %v421_v48  ;;  %s422_s29 = smov [#allocation5]  }
  0x14   :  { %v319_v15 = vunpack.c.l.bf16 %v318_v10  ;;  %v320_v16 = vunpack.c.h.bf16 %v318_v10  ;;  %s298_s5 = sshll.u32 %s422_s29, 4  ;;  %s299_s5 = int_to_ptr.vmem [resolvable:$true] %s298_s5 }
  0x15   :  { %91 = vperm.xlu1 %374, %v310_v3   ;;  %83 = vperm.xlu0 %373, %v308_v4   ;;  %v213_v3 = vld [vmem:[%s524_s4] sm:$0x1]  ;;  %s391_s30 = scalar_lea.vmem %s299_s5, 16  ;;  %s395_s7 = scalar_lea.vmem %s299_s5, 32 }
  0x16   :  { %p392_p5 = scmp.ne.s32.totalorder %s299_s5, %s391_s30  ;;  %p396_p6 = scmp.lt.s32.totalorder %s299_s5, %s299_s5 }
  0x17   :  { %v109_v38 = vstv %s108_s25  ;;  %p397_p7 = scmp.lt.s32.totalorder %s395_s7, %s391_s30 }
  0x18   :  { %v215_v4 = vstv %s315_s28 }
  0x19   :  { %130 = vperm.xlu1 %374, %v120_v5   ;;  %125 = vperm.xlu0 %373, %v119_v6   ;;  %p398_p8 = por %p397_p7, %p396_p6 }
  0x1b   :  { %p399_p9 = pnand %p398_p8, %p392_p5 }
  0x1d   :  { %140 = vperm.xlu1 %374, %v122_v7   ;;  %135 = vperm.xlu0 %373, %v121_v8  }
  0x90   :  { %v88_v12 = vpop.permute.xlu1 %87  ;;  %v80_v14 = vpop.permute.xlu0 %79 }
  0x91   :  { %v94_v25 = vmul.f32 %v319_v15, %v80_v14  ;;  %v95_v26 = vmul.f32 %v320_v16, %v80_v14  ;;  %v98_v30 = vmul.f32 %v327_v20, %v88_v12  ;;  %v99_v31 = vmul.f32 %v328_v21, %v88_v12 }
  0x94   :  { %v84_v24 = vpop.permute.xlu0 %83  ;;  %v92_v29 = vpop.permute.xlu1 %91 }
  0x95   :  { %v96_v27 = vmul.f32 %v323_v18, %v84_v24  ;;  %v97_v28 = vmul.f32 %v324_v19, %v84_v24  ;;  %v100_v34 = vmul.f32 %v331_v22, %v92_v29  ;;  %v101_v35 = vmul.f32 %v332_v23, %v92_v29 }
  0x97   :  { %v102_v32 = vadd.f32 %v96_v27, %v94_v25  ;;  %v105_v33 = vadd.f32 %v97_v28, %v95_v26 }
  0x98   :  { %v126_v49 = vpop.permute.xlu0 %125  ;;  %v131_v50 = vpop.permute.xlu1 %130 }
  0x99   :  { %v103_v36 = vadd.f32 %v102_v32, %v98_v30  ;;  %v106_v37 = vadd.f32 %v105_v33, %v99_v31 }
  0x9b   :  { %v104_v39 = vadd.f32 %v103_v36, %v100_v34  ;;  %v107_v40 = vadd.f32 %v106_v37, %v101_v35 }
  0x9c   :  { %v136_v51 = vpop.permute.xlu0 %135  ;;  %v141_v55 = vpop.permute.xlu1 %140 }
  0x9d   :  { %v110_v41 = vadd.f32 %v109_v38, %v104_v39  ;;  %v111_v42 = vadd.f32 %v109_v38, %v107_v40 }
  0x9f   :  { %v112_v43 = vmax.f32 %v110_v41, 0.0  ;;  %v113_v44 = vmax.f32 %v111_v42, 0.0 }
  0xa1   :  { %v118_v45 = vpack.c.bf16 %v113_v44, %v112_v43 }
  0xa3   :  { %344 = vmatprep.subr.bf16.mxu0 %v118_v45 }
  0xa4   :  { %345 = vmatpush3.bf16.msra.mxu0 %v118_v45 }
  0xa7   :  { %347 = vmatmul.mubr.msk.bf16.vlgmr.msra.gmra.mrb[0].mxu0 %vm153_vm0, %v376_v46 }
 0x17a   :  { %v348_v52 = vpop.f32.mrb[0].mxu0 }
 0x17b   :  { %v203_v53 = vadd.f32 %v348_v52, %v136_v51  ;;  %v194_v54 = vpop.f32.mrb[1].mxu0 }
 0x17c   :  { %v195_v56 = vadd.f32 %v194_v54, %v126_v49  ;;  %v349_v57 = vpop.f32.mrb[2].mxu0 }
 0x17d   :  { %v206_v58 = vadd.f32 %v349_v57, %v141_v55  ;;  %v197_v59 = vpop.f32.mrb[3].mxu0  ;;  %v211_v61 = vmax.f32 %v203_v53, 0.0 }
 0x17e   :  { %v198_v60 = vadd.f32 %v197_v59, %v131_v50  ;;  %v209_v63 = vmax.f32 %v195_v56, 0.0 }
 0x17f   :  { %v212_v62 = vmax.f32 %v206_v58, 0.0 }
 0x180   :  { %v210_v0 = vmax.f32 %v198_v60, 0.0 }
 0x181   :  { %v365_v1 = vpack.c.bf16 %v212_v62, %v211_v61 }
 0x182   :  { %v362_v2 = vpack.c.bf16 %v210_v0, %v209_v63 }
 0x184   :  { %363 = vmatpush3.bf16.msra.mxu1 %v362_v2 }
 0x185   :  { %364 = vmatprep.subr.bf16.mxu1 %v419_v47 }
 0x188   :  { %366 = vmatpush3.bf16.msra.mxu1 %v365_v1 }
 0x18b   :  { %359 = vmatmul.mubr.msk.f32.vlgmr.msra.gmra.mrb[0].mxu1 %vm216_vm2, %v213_v3 }
 0x25e   :  { %v286_v5 = vpop.f32.mrb[0].mxu1 }
 0x25f   :  { %v287_v6 = vadd.f32 %v286_v5, %v215_v4  ;;  %v360_v7 = vpop.f32.mrb[1].mxu1 }
 0x261   :  { %377 = vtanh.f32 %v287_v6 }
 0x26b   :  { %v378_v8 = vpop.eup %377 }
 0x26c   :  { %291 = vst [vmem:[#allocation5] sm:$0x1] %v378_v8 }
 0x26d   :  { %402 = shalt.err (!%p399_p9)
}
 0x26e   :  { %s403_s9 = scalar_lea.hbm %s526_s6, 16 }
 0x26f   :  { %p404_p10 = scmp.ne.s32.totalorder %s526_s6, %s403_s9  ;;  %p407_p11 = scmp.lt.u32.totalorder %s403_s9, %s526_s6 }
 0x271   :  { %p409_p12 = pnand %p407_p11, %p404_p10 }
 0x273   :  { %412 = shalt.err (!%p409_p12)
}
 0x274   :  { %301 = dma.vmem_to_hbm [thread:$0]  %s299_s5, 16, %s526_s6, [#allocation3]  }
 0x275   :  { %415 = dma.done.wait [#allocation3], 16  }
 0x276   :  { %416 = vsyncadd [#allocation3], 4294967280 }
 0x277   :  { %305 = vsyncpa [#allocation3], 1 }
 0x278   :  { %306 = vsyncpa [#allocation4], 1 }

</bundles_post_ra>
